<compile_context>
chip_gen: v5e
topology: v5e:2x2
jax: 0.10.0
libtpu: 0.0.40
codegen_flags: <defaults>
</compile_context>

<pallas_src>
import functools

import jax
import jax.numpy as jnp
from jax import lax
from jax.experimental import pallas as pl
from jax.experimental.pallas import tpu as pltpu

_UNROLL_MAX = 16  # full-unroll threshold for the rank reconstruction loop


def _round_up(x, m):
    return (x + m - 1) // m * m


def _vmem_capacity_bytes():
    try:
        info = pltpu.get_tpu_info()
        cap = getattr(info, "vmem_capacity_bytes", None)
        if cap:
            return int(cap)
    except Exception:
        pass
    return 64 * 1024 * 1024  # conservative (v7x-sized) fallback


def _make_proj_wt_spec(block_shape, index_map, extra_buffer):
    """proj_wt BlockSpec, optionally 3-deep buffered (hide the big DMA)."""
    if extra_buffer:
        try:
            return pl.BlockSpec(block_shape, index_map,
                                pipeline_mode=pl.Buffered(3))
        except TypeError:
            pass  # older API without pipeline_mode: fall back to default 2-deep
    return pl.BlockSpec(block_shape, index_map)


# ---------------------------------------------------------------------------
# Fused kernel: low-rank weight reconstruction + linear layer
# ---------------------------------------------------------------------------
def _ldafc_kernel(a_ref, x_ref, pw_ref, pb_ref, o_ref, wt_ref, b_ref,
                  wacc_ref=None, *, appr_size):
    # a_ref   : SMEM (apprSize,) f32              -- rank coefficients (apprWeight)
    # x_ref   : VMEM (tile_m, inputDim) mxu_dtype -- activations
    # pw_ref  : VMEM (apprSize, inputDim, tile_n) -- proj, weight part, W.T layout
    # pb_ref  : VMEM (apprSize, 1, tile_n)        -- proj, bias part
    # o_ref   : VMEM (tile_m, tile_n)
    # wt_ref  : VMEM scratch (inputDim, tile_n) mxu_dtype -- reconstructed W.T tile
    # b_ref   : VMEM scratch (1, tile_n) f32              -- reconstructed bias tile
    # wacc_ref: optional VMEM scratch (inputDim, tile_n) f32 (fori path, bf16 MXU)

    # Reconstruct the W.T / bias tile once per output tile.  The batch axis is
    # the inner, SEQUENTIAL ("arbitrary") grid axis, so the scratch persists
    # and is reused for all batch tiles of this output tile.
    @pl.when(pl.program_id(1) == 0)
    def _reconstruct():
        if appr_size <= _UNROLL_MAX:
            # Small rank: unrolled VPU FMAs, f32 accumulation in registers.
            acc_w = a_ref[0] * pw_ref[0].astype(jnp.float32)
            acc_b = a_ref[0] * pb_ref[0].astype(jnp.float32)
            for r in range(1, appr_size):
                acc_w = acc_w + a_ref[r] * pw_ref[r].astype(jnp.float32)
                acc_b = acc_b + a_ref[r] * pb_ref[r].astype(jnp.float32)
            wt_ref[...] = acc_w.astype(wt_ref.dtype)
            b_ref[...] = acc_b
        else:
            # Large rank: bounded live-ranges via fori_loop accumulating into
            # an f32 scratch (wacc_ref when the MXU operand scratch is bf16).
            acc_ref = wt_ref if wacc_ref is None else wacc_ref
            acc_ref[...] = jnp.zeros_like(acc_ref)
            b_ref[...] = jnp.zeros_like(b_ref)

            def _body(r, carry):
                acc_ref[...] = acc_ref[...] + a_ref[r] * pw_ref[r].astype(acc_ref.dtype)
                b_ref[...] = b_ref[...] + a_ref[r] * pb_ref[r].astype(jnp.float32)
                return carry

            lax.fori_loop(0, appr_size, _body, 0)
            if wacc_ref is not None:
                wt_ref[...] = wacc_ref[...].astype(wt_ref.dtype)

    # Linear layer: native (bf16 x bf16 -> f32) MXU matmul + bias broadcast.
    acc = jnp.dot(x_ref[...], wt_ref[...], preferred_element_type=jnp.float32)
    o_ref[...] = (acc + b_ref[...]).astype(o_ref.dtype)


def ldafc_forward(x, appr_weight, proj_wt, proj_b, output_dim,
                  *, mxu_dtype=jnp.bfloat16, out_dtype=None):
    batch, input_dim = x.shape
    appr_size, _, out_pad = proj_wt.shape
    out_dtype = x.dtype if out_dtype is None else out_dtype

    psize = jnp.dtype(proj_wt.dtype).itemsize
    xsize = jnp.dtype(mxu_dtype).itemsize
    osize = jnp.dtype(out_dtype).itemsize
    wsize = jnp.dtype(mxu_dtype).itemsize
    need_wacc = (appr_size > _UNROLL_MAX and
                 jnp.dtype(mxu_dtype) != jnp.dtype(jnp.float32))

    # ---- per-generation VMEM budget ---------------------------------------
    vmem_cap = _vmem_capacity_bytes()          # 128 MiB v5e/v6e, 64 MiB v7x
    budget = int(0.68 * vmem_cap)              # tiling estimate budget
    vmem_limit = int(0.88 * vmem_cap)          # scoped limit (>=20% headroom)

    # ---- batch (M) tiling ---------------------------------------------------
    if batch <= 256:
        tile_m = _round_up(batch, 8)           # sublane multiple, no masked rows
        m_pad = tile_m
    else:
        tile_m, m_pad = 256, _round_up(batch, 256)
        for cand in (128, 64):                 # minimize padding waste
            mp = _round_up(batch, cand)
            if mp < m_pad:
                tile_m, m_pad = cand, mp

    # Cast once in the wrapper: halves the x HBM stream and gives the MXU a
    # native bf16 operand (accumulation stays f32 inside the kernel).
    x_p = x if x.dtype == jnp.dtype(mxu_dtype) else x.astype(mxu_dtype)
    if m_pad != batch:
        x_p = jnp.pad(x_p, ((0, m_pad - batch), (0, 0)))

    # ---- output (N) tiling under the VMEM budget ----------------------------
    def _vmem_estimate(tn):
        est = (2 * appr_size * input_dim * tn * psize   # proj_wt (double buffered)
               + 2 * appr_size * tn * psize             # proj_b
               + 2 * tile_m * input_dim * xsize         # x block
               + 2 * tile_m * tn * osize                # output block
               + tile_m * tn * 4                        # f32 matmul result temp
               + input_dim * tn * wsize                 # W.T scratch
               + tn * 4)                                # bias scratch
        if need_wacc:
            est += input_dim * tn * 4
        return est

    fitting = [c for c in (1024, 512, 256, 128)
               if out_pad % c == 0 and _vmem_estimate(c) <= budget]
    if not fitting:
        fitting = [128]
    # v7x: prefer >=2 output tiles so the "parallel" axis shards across both TCs.
    multi = [c for c in fitting if out_pad // c >= 2]
    tile_n = multi[0] if multi else fitting[0]

    n_out_tiles = out_pad // tile_n
    n_batch_tiles = m_pad // tile_m
    grid = (n_out_tiles, n_batch_tiles)

    # Deeper buffering of the dominant proj_wt stream when there is a single
    # batch tile (the big DMA changes every grid step and sits on the critical
    # path together with the VPU reconstruction).
    extra_buffer = (
        n_batch_tiles == 1 and n_out_tiles >= 2
        and _vmem_estimate(tile_n) + appr_size * input_dim * tile_n * psize <= budget
    )

    scratch_shapes = [
        pltpu.VMEM((input_dim, tile_n), mxu_dtype),   # reconstructed W.T tile
        pltpu.VMEM((1, tile_n), jnp.float32),         # reconstructed bias tile
    ]
    if need_wacc:
        scratch_shapes.append(pltpu.VMEM((input_dim, tile_n), jnp.float32))

    proj_bytes = appr_size * (input_dim + 1) * out_pad * psize
    cost = pl.CostEstimate(
        flops=2 * m_pad * input_dim * out_pad + 2 * appr_size * input_dim * out_pad,
        transcendentals=0,
        bytes_accessed=(proj_bytes
                        + n_out_tiles * m_pad * input_dim * xsize
                        + m_pad * out_pad * osize),
    )

    out = pl.pallas_call(
        functools.partial(_ldafc_kernel, appr_size=appr_size),
        out_shape=jax.ShapeDtypeStruct((m_pad, out_pad), out_dtype),
        grid_spec=pltpu.PrefetchScalarGridSpec(
            num_scalar_prefetch=0,
            grid=grid,
            in_specs=[
                # rank coefficients: tiny, live in SMEM, read as f32 scalars
                pl.BlockSpec(memory_space=pltpu.MemorySpace.SMEM),
                pl.BlockSpec((tile_m, input_dim), lambda j, i: (i, 0)),
                _make_proj_wt_spec((appr_size, input_dim, tile_n),
                                   lambda j, i: (0, 0, j), extra_buffer),
                pl.BlockSpec((appr_size, 1, tile_n), lambda j, i: (0, 0, j)),
            ],
            out_specs=pl.BlockSpec((tile_m, tile_n), lambda j, i: (i, j)),
            scratch_shapes=scratch_shapes,
        ),
        compiler_params=pltpu.CompilerParams(
            # NOTE: the batch axis MUST stay "arbitrary" (sequential on one TC):
            # the W.T tile cached in scratch at batch-tile 0 is reused by all
            # later batch tiles of the same output tile.
            dimension_semantics=("parallel", "arbitrary"),
            vmem_limit_bytes=vmem_limit,
        ),
        cost_estimate=cost,
    )(appr_weight.reshape(appr_size).astype(jnp.float32), x_p, proj_wt, proj_b)

    return out[:batch, :output_dim]


# ---------------------------------------------------------------------------
# LDAFC module (JAX glue around the fused Pallas kernel)
# ---------------------------------------------------------------------------
class LDAFC:
    def __init__(self, input_dim, output_dim, appr_size, key,
                 param_dtype=jnp.bfloat16, mxu_dtype=jnp.bfloat16,
                 out_dtype=None):
        self.input_dim = input_dim
        self.output_dim = output_dim
        self.appr_dim = appr_size
        self.weight_dim = input_dim * output_dim
        self.bias_dim = output_dim
        self.proj_dim = self.weight_dim + self.bias_dim
        self.mxu_dtype = mxu_dtype
        self.out_dtype = out_dtype

        k_proj, k_appr = jax.random.split(key, 2)
        proj = jax.random.normal(k_proj, (self.proj_dim, appr_size), jnp.float32)
        # column-normalize, matching torch.linalg.norm(self.proj, dim=0)
        self.proj = proj / jnp.linalg.norm(proj, axis=0)
        self.appr_weight = jax.random.normal(k_appr, (appr_size, 1), jnp.float32)

        # One-time re-layout of the FIXED projection into kernel-friendly,
        # lane-dense form (W.T layout), padded to a 128-multiple output dim,
        # stored in param_dtype (bf16 by default: halves the dominant HBM read;
        # reconstruction still accumulates in f32 inside the kernel).
        out_pad = _round_up(output_dim, 128)
        pw = (self.proj[: self.weight_dim]
              .reshape(output_dim, input_dim, appr_size)
              .transpose(2, 1, 0))                         # (r, d, n)
        pb = self.proj[self.weight_dim:].T.reshape(appr_size, 1, output_dim)
        pad_n = out_pad - output_dim
        self.proj_wt = jnp.pad(pw, ((0, 0), (0, 0), (0, pad_n))).astype(param_dtype)
        self.proj_b = jnp.pad(pb, ((0, 0), (0, 0), (0, pad_n))).astype(param_dtype)

        # TODO(synk): import_basis (numpy pseudo-inverse init) is init-time host
        # code, not part of the forward pass; not translated to Pallas.

    def __call__(self, x):
        return ldafc_forward(x, self.appr_weight, self.proj_wt, self.proj_b,
                             self.output_dim, mxu_dtype=self.mxu_dtype,
                             out_dtype=self.out_dtype)


def _reference(x, proj, appr_weight, input_dim, output_dim):
    weight_dim = input_dim * output_dim
    tmp = proj @ appr_weight
    w = tmp[:weight_dim, :].reshape(output_dim, input_dim)
    b = tmp[weight_dim:, :]
    return x @ w.T + b.T


if __name__ == "__main__":
    input_dim, output_dim, appr_size, batch = 32, 16, 8, 4

    key = jax.random.PRNGKey(0)
    k_mod, k_x = jax.random.split(key)
    x = jax.random.normal(k_x, (batch, input_dim), jnp.float32)

    # 1) exact path (f32 params / f32 MXU operands) -- tight tolerance
    model_f32 = LDAFC(input_dim, output_dim, appr_size, k_mod,
                      param_dtype=jnp.float32, mxu_dtype=jnp.float32)
    out_f32 = jax.block_until_ready(model_f32(x))
    ref = _reference(x, model_f32.proj, model_f32.appr_weight, input_dim, output_dim)
    assert out_f32.shape == (batch, output_dim)
    assert jnp.allclose(out_f32, ref, atol=1e-4, rtol=1e-4), "f32 path mismatch"

    # 2) default fast path (bf16 proj stream + bf16 MXU operands, f32 accumulation)
    model = LDAFC(input_dim, output_dim, appr_size, k_mod)
    out_fast = jax.block_until_ready(model(x))
    assert out_fast.shape == (batch, output_dim)
    assert jnp.allclose(out_fast.astype(jnp.float32), ref, atol=5e-2, rtol=5e-2), \
        "bf16 path mismatch"

    # 3) large-rank path (fori_loop reconstruction + f32 acc scratch), bf16 stream
    big_rank = 24
    model_big = LDAFC(input_dim, output_dim, big_rank, k_mod)
    out_big = jax.block_until_ready(model_big(x))
    ref_big = _reference(x, model_big.proj, model_big.appr_weight,
                         input_dim, output_dim)
    assert out_big.shape == (batch, output_dim)
    assert jnp.allclose(out_big.astype(jnp.float32), ref_big, atol=5e-2, rtol=5e-2), \
        "large-rank path mismatch"

    print("KERNEL_OK")
</pallas_src>

<mosaic_0001>
module attributes {stable_mosaic.version = 11 : i64} {
  func.func @_ldafc_kernel(%arg0: i32, %arg1: i32, %arg2: memref<8xf32, #tpu.memory_space<smem>>, %arg3: memref<8x32xf32, #tpu.memory_space<vmem>>, %arg4: memref<8x32x128xf32, #tpu.memory_space<vmem>>, %arg5: memref<8x1x128xf32, #tpu.memory_space<vmem>>, %arg6: memref<8x128xf32, #tpu.memory_space<vmem>>, %arg7: memref<32x128xf32, #tpu.memory_space<vmem>>, %arg8: memref<1x128xf32, #tpu.memory_space<vmem>>) attributes {dimension_semantics = [#tpu.dimension_semantics<parallel>, #tpu.dimension_semantics<arbitrary>], iteration_bounds = array<i64: 1, 1>, scalar_prefetch = 0 : i64, scratch_operands = 2 : i64, tpu.core_type = #tpu.core_type<tc>, window_params = [{transform_indices = @transform_0, window_bounds = array<i64: 8>}, {transform_indices = @transform_1, window_bounds = array<i64: 8, 32>}, {transform_indices = @transform_2, window_bounds = array<i64: 8, 32, 128>}, {transform_indices = @transform_3, window_bounds = array<i64: 8, 1, 128>}, {transform_indices = @transform_4, window_bounds = array<i64: 8, 128>}]} {
    %c0_i32 = arith.constant 0 : i32
    %0 = arith.cmpi eq, %arg1, %c0_i32 : i32
    %1 = arith.extui %0 : i1 to i32
    %c0_i32_0 = arith.constant 0 : i32
    %2 = arith.cmpi ne, %1, %c0_i32_0 : i32
    scf.if %2 {
      %c0_8 = arith.constant 0 : index
      %10 = memref.load %arg2[%c0_8] : memref<8xf32, #tpu.memory_space<smem>>
      %c0_9 = arith.constant 0 : index
      %c0_10 = arith.constant 0 : index
      %c0_11 = arith.constant 0 : index
      %11 = vector.load %arg4[%c0_9, %c0_10, %c0_11] : memref<8x32x128xf32, #tpu.memory_space<vmem>>, vector<1x32x128xf32>
      %12 = vector.shape_cast %11 : vector<1x32x128xf32> to vector<32x128xf32>
      %13 = vector.broadcast %10 : f32 to vector<32x128xf32>
      %14 = arith.mulf %13, %12 : vector<32x128xf32>
      %c0_12 = arith.constant 0 : index
      %15 = memref.load %arg2[%c0_12] : memref<8xf32, #tpu.memory_space<smem>>
      %c0_13 = arith.constant 0 : index
      %c0_14 = arith.constant 0 : index
      %c0_15 = arith.constant 0 : index
      %16 = vector.load %arg5[%c0_13, %c0_14, %c0_15] : memref<8x1x128xf32, #tpu.memory_space<vmem>>, vector<1x1x128xf32>
      %17 = vector.shape_cast %16 : vector<1x1x128xf32> to vector<1x128xf32>
      %18 = vector.broadcast %15 : f32 to vector<1x128xf32>
      %19 = arith.mulf %18, %17 : vector<1x128xf32>
      %c1 = arith.constant 1 : index
      %20 = memref.load %arg2[%c1] : memref<8xf32, #tpu.memory_space<smem>>
      %c1_16 = arith.constant 1 : index
      %c0_17 = arith.constant 0 : index
      %c0_18 = arith.constant 0 : index
      %21 = vector.load %arg4[%c1_16, %c0_17, %c0_18] : memref<8x32x128xf32, #tpu.memory_space<vmem>>, vector<1x32x128xf32>
      %22 = vector.shape_cast %21 : vector<1x32x128xf32> to vector<32x128xf32>
      %23 = vector.broadcast %20 : f32 to vector<32x128xf32>
      %24 = arith.mulf %23, %22 : vector<32x128xf32>
      %25 = arith.addf %14, %24 : vector<32x128xf32>
      %c1_19 = arith.constant 1 : index
      %26 = memref.load %arg2[%c1_19] : memref<8xf32, #tpu.memory_space<smem>>
      %c1_20 = arith.constant 1 : index
      %c0_21 = arith.constant 0 : index
      %c0_22 = arith.constant 0 : index
      %27 = vector.load %arg5[%c1_20, %c0_21, %c0_22] : memref<8x1x128xf32, #tpu.memory_space<vmem>>, vector<1x1x128xf32>
      %28 = vector.shape_cast %27 : vector<1x1x128xf32> to vector<1x128xf32>
      %29 = vector.broadcast %26 : f32 to vector<1x128xf32>
      %30 = arith.mulf %29, %28 : vector<1x128xf32>
      %31 = arith.addf %19, %30 : vector<1x128xf32>
      %c2 = arith.constant 2 : index
      %32 = memref.load %arg2[%c2] : memref<8xf32, #tpu.memory_space<smem>>
      %c2_23 = arith.constant 2 : index
      %c0_24 = arith.constant 0 : index
      %c0_25 = arith.constant 0 : index
      %33 = vector.load %arg4[%c2_23, %c0_24, %c0_25] : memref<8x32x128xf32, #tpu.memory_space<vmem>>, vector<1x32x128xf32>
      %34 = vector.shape_cast %33 : vector<1x32x128xf32> to vector<32x128xf32>
      %35 = vector.broadcast %32 : f32 to vector<32x128xf32>
      %36 = arith.mulf %35, %34 : vector<32x128xf32>
      %37 = arith.addf %25, %36 : vector<32x128xf32>
      %c2_26 = arith.constant 2 : index
      %38 = memref.load %arg2[%c2_26] : memref<8xf32, #tpu.memory_space<smem>>
      %c2_27 = arith.constant 2 : index
      %c0_28 = arith.constant 0 : index
      %c0_29 = arith.constant 0 : index
      %39 = vector.load %arg5[%c2_27, %c0_28, %c0_29] : memref<8x1x128xf32, #tpu.memory_space<vmem>>, vector<1x1x128xf32>
      %40 = vector.shape_cast %39 : vector<1x1x128xf32> to vector<1x128xf32>
      %41 = vector.broadcast %38 : f32 to vector<1x128xf32>
      %42 = arith.mulf %41, %40 : vector<1x128xf32>
      %43 = arith.addf %31, %42 : vector<1x128xf32>
      %c3 = arith.constant 3 : index
      %44 = memref.load %arg2[%c3] : memref<8xf32, #tpu.memory_space<smem>>
      %c3_30 = arith.constant 3 : index
      %c0_31 = arith.constant 0 : index
      %c0_32 = arith.constant 0 : index
      %45 = vector.load %arg4[%c3_30, %c0_31, %c0_32] : memref<8x32x128xf32, #tpu.memory_space<vmem>>, vector<1x32x128xf32>
      %46 = vector.shape_cast %45 : vector<1x32x128xf32> to vector<32x128xf32>
      %47 = vector.broadcast %44 : f32 to vector<32x128xf32>
      %48 = arith.mulf %47, %46 : vector<32x128xf32>
      %49 = arith.addf %37, %48 : vector<32x128xf32>
      %c3_33 = arith.constant 3 : index
      %50 = memref.load %arg2[%c3_33] : memref<8xf32, #tpu.memory_space<smem>>
      %c3_34 = arith.constant 3 : index
      %c0_35 = arith.constant 0 : index
      %c0_36 = arith.constant 0 : index
      %51 = vector.load %arg5[%c3_34, %c0_35, %c0_36] : memref<8x1x128xf32, #tpu.memory_space<vmem>>, vector<1x1x128xf32>
      %52 = vector.shape_cast %51 : vector<1x1x128xf32> to vector<1x128xf32>
      %53 = vector.broadcast %50 : f32 to vector<1x128xf32>
      %54 = arith.mulf %53, %52 : vector<1x128xf32>
      %55 = arith.addf %43, %54 : vector<1x128xf32>
      %c4 = arith.constant 4 : index
      %56 = memref.load %arg2[%c4] : memref<8xf32, #tpu.memory_space<smem>>
      %c4_37 = arith.constant 4 : index
      %c0_38 = arith.constant 0 : index
      %c0_39 = arith.constant 0 : index
      %57 = vector.load %arg4[%c4_37, %c0_38, %c0_39] : memref<8x32x128xf32, #tpu.memory_space<vmem>>, vector<1x32x128xf32>
      %58 = vector.shape_cast %57 : vector<1x32x128xf32> to vector<32x128xf32>
      %59 = vector.broadcast %56 : f32 to vector<32x128xf32>
      %60 = arith.mulf %59, %58 : vector<32x128xf32>
      %61 = arith.addf %49, %60 : vector<32x128xf32>
      %c4_40 = arith.constant 4 : index
      %62 = memref.load %arg2[%c4_40] : memref<8xf32, #tpu.memory_space<smem>>
      %c4_41 = arith.constant 4 : index
      %c0_42 = arith.constant 0 : index
      %c0_43 = arith.constant 0 : index
      %63 = vector.load %arg5[%c4_41, %c0_42, %c0_43] : memref<8x1x128xf32, #tpu.memory_space<vmem>>, vector<1x1x128xf32>
      %64 = vector.shape_cast %63 : vector<1x1x128xf32> to vector<1x128xf32>
      %65 = vector.broadcast %62 : f32 to vector<1x128xf32>
      %66 = arith.mulf %65, %64 : vector<1x128xf32>
      %67 = arith.addf %55, %66 : vector<1x128xf32>
      %c5 = arith.constant 5 : index
      %68 = memref.load %arg2[%c5] : memref<8xf32, #tpu.memory_space<smem>>
      %c5_44 = arith.constant 5 : index
      %c0_45 = arith.constant 0 : index
      %c0_46 = arith.constant 0 : index
      %69 = vector.load %arg4[%c5_44, %c0_45, %c0_46] : memref<8x32x128xf32, #tpu.memory_space<vmem>>, vector<1x32x128xf32>
      %70 = vector.shape_cast %69 : vector<1x32x128xf32> to vector<32x128xf32>
      %71 = vector.broadcast %68 : f32 to vector<32x128xf32>
      %72 = arith.mulf %71, %70 : vector<32x128xf32>
      %73 = arith.addf %61, %72 : vector<32x128xf32>
      %c5_47 = arith.constant 5 : index
      %74 = memref.load %arg2[%c5_47] : memref<8xf32, #tpu.memory_space<smem>>
      %c5_48 = arith.constant 5 : index
      %c0_49 = arith.constant 0 : index
      %c0_50 = arith.constant 0 : index
      %75 = vector.load %arg5[%c5_48, %c0_49, %c0_50] : memref<8x1x128xf32, #tpu.memory_space<vmem>>, vector<1x1x128xf32>
      %76 = vector.shape_cast %75 : vector<1x1x128xf32> to vector<1x128xf32>
      %77 = vector.broadcast %74 : f32 to vector<1x128xf32>
      %78 = arith.mulf %77, %76 : vector<1x128xf32>
      %79 = arith.addf %67, %78 : vector<1x128xf32>
      %c6 = arith.constant 6 : index
      %80 = memref.load %arg2[%c6] : memref<8xf32, #tpu.memory_space<smem>>
      %c6_51 = arith.constant 6 : index
      %c0_52 = arith.constant 0 : index
      %c0_53 = arith.constant 0 : index
      %81 = vector.load %arg4[%c6_51, %c0_52, %c0_53] : memref<8x32x128xf32, #tpu.memory_space<vmem>>, vector<1x32x128xf32>
      %82 = vector.shape_cast %81 : vector<1x32x128xf32> to vector<32x128xf32>
      %83 = vector.broadcast %80 : f32 to vector<32x128xf32>
      %84 = arith.mulf %83, %82 : vector<32x128xf32>
      %85 = arith.addf %73, %84 : vector<32x128xf32>
      %c6_54 = arith.constant 6 : index
      %86 = memref.load %arg2[%c6_54] : memref<8xf32, #tpu.memory_space<smem>>
      %c6_55 = arith.constant 6 : index
      %c0_56 = arith.constant 0 : index
      %c0_57 = arith.constant 0 : index
      %87 = vector.load %arg5[%c6_55, %c0_56, %c0_57] : memref<8x1x128xf32, #tpu.memory_space<vmem>>, vector<1x1x128xf32>
      %88 = vector.shape_cast %87 : vector<1x1x128xf32> to vector<1x128xf32>
      %89 = vector.broadcast %86 : f32 to vector<1x128xf32>
      %90 = arith.mulf %89, %88 : vector<1x128xf32>
      %91 = arith.addf %79, %90 : vector<1x128xf32>
      %c7 = arith.constant 7 : index
      %92 = memref.load %arg2[%c7] : memref<8xf32, #tpu.memory_space<smem>>
      %c7_58 = arith.constant 7 : index
      %c0_59 = arith.constant 0 : index
      %c0_60 = arith.constant 0 : index
      %93 = vector.load %arg4[%c7_58, %c0_59, %c0_60] : memref<8x32x128xf32, #tpu.memory_space<vmem>>, vector<1x32x128xf32>
      %94 = vector.shape_cast %93 : vector<1x32x128xf32> to vector<32x128xf32>
      %95 = vector.broadcast %92 : f32 to vector<32x128xf32>
      %96 = arith.mulf %95, %94 : vector<32x128xf32>
      %97 = arith.addf %85, %96 : vector<32x128xf32>
      %c7_61 = arith.constant 7 : index
      %98 = memref.load %arg2[%c7_61] : memref<8xf32, #tpu.memory_space<smem>>
      %c7_62 = arith.constant 7 : index
      %c0_63 = arith.constant 0 : index
      %c0_64 = arith.constant 0 : index
      %99 = vector.load %arg5[%c7_62, %c0_63, %c0_64] : memref<8x1x128xf32, #tpu.memory_space<vmem>>, vector<1x1x128xf32>
      %100 = vector.shape_cast %99 : vector<1x1x128xf32> to vector<1x128xf32>
      %101 = vector.broadcast %98 : f32 to vector<1x128xf32>
      %102 = arith.mulf %101, %100 : vector<1x128xf32>
      %103 = arith.addf %91, %102 : vector<1x128xf32>
      %c0_65 = arith.constant 0 : index
      %c0_66 = arith.constant 0 : index
      %104 = vector.load %arg7[%c0_65, %c0_66] : memref<32x128xf32, #tpu.memory_space<vmem>>, vector<32x128xf32>
      tpu.vector_store %arg7[%c0_65, %c0_66], %97 {strides = array<i32>} : memref<32x128xf32, #tpu.memory_space<vmem>>, vector<32x128xf32>,
      %c0_67 = arith.constant 0 : index
      %c0_68 = arith.constant 0 : index
      %105 = vector.load %arg8[%c0_67, %c0_68] : memref<1x128xf32, #tpu.memory_space<vmem>>, vector<1x128xf32>
      tpu.vector_store %arg8[%c0_67, %c0_68], %103 {strides = array<i32>} : memref<1x128xf32, #tpu.memory_space<vmem>>, vector<1x128xf32>,
    } else {
    }
    %c0 = arith.constant 0 : index
    %c0_1 = arith.constant 0 : index
    %3 = vector.load %arg3[%c0, %c0_1] : memref<8x32xf32, #tpu.memory_space<vmem>>, vector<8x32xf32>
    %c0_2 = arith.constant 0 : index
    %c0_3 = arith.constant 0 : index
    %4 = vector.load %arg7[%c0_2, %c0_3] : memref<32x128xf32, #tpu.memory_space<vmem>>, vector<32x128xf32>
    %cst = arith.constant dense<0.000000e+00> : vector<8x128xf32>
    %5 = tpu.matmul %3, %4, %cst {dimension_numbers = #tpu.dot_dimension_numbers<[1], [0], [0], [1], [0, 0, 1, 1], [], []>} : vector<8x32xf32>, vector<32x128xf32>, vector<8x128xf32> -> vector<8x128xf32>
    %c0_4 = arith.constant 0 : index
    %c0_5 = arith.constant 0 : index
    %6 = vector.load %arg8[%c0_4, %c0_5] : memref<1x128xf32, #tpu.memory_space<vmem>>, vector<1x128xf32>
    %7 = vector.broadcast %6 : vector<1x128xf32> to vector<8x128xf32>
    %8 = arith.addf %5, %7 : vector<8x128xf32>
    %c0_6 = arith.constant 0 : index
    %c0_7 = arith.constant 0 : index
    %9 = vector.load %arg6[%c0_6, %c0_7] : memref<8x128xf32, #tpu.memory_space<vmem>>, vector<8x128xf32>
    tpu.vector_store %arg6[%c0_6, %c0_7], %8 {strides = array<i32>} : memref<8x128xf32, #tpu.memory_space<vmem>>, vector<8x128xf32>,
    return
  }
  func.func @transform_0(%arg0: i32, %arg1: i32) -> i32 {
    %c0_i32 = arith.constant 0 : i32
    %c0_i32_0 = arith.constant 0 : i32
    return %c0_i32 : i32
  }
  func.func @transform_1(%arg0: i32, %arg1: i32) -> (i32, i32) {
    %c0_i32 = arith.constant 0 : i32
    %c0_i32_0 = arith.constant 0 : i32
    return %arg1, %c0_i32 : i32, i32
  }
  func.func @transform_2(%arg0: i32, %arg1: i32) -> (i32, i32, i32) {
    %c0_i32 = arith.constant 0 : i32
    %c0_i32_0 = arith.constant 0 : i32
    %c0_i32_1 = arith.constant 0 : i32
    return %c0_i32, %c0_i32_0, %arg0 : i32, i32, i32
  }
  func.func @transform_3(%arg0: i32, %arg1: i32) -> (i32, i32, i32) {
    %c0_i32 = arith.constant 0 : i32
    %c0_i32_0 = arith.constant 0 : i32
    %c0_i32_1 = arith.constant 0 : i32
    return %c0_i32, %c0_i32_0, %arg0 : i32, i32, i32
  }
  func.func @transform_4(%arg0: i32, %arg1: i32) -> (i32, i32) {
    %c0_i32 = arith.constant 0 : i32
    return %arg1, %arg0 : i32, i32
  }
}

</mosaic_0001>

<bundles_post_ra>
// kernel: tpu_custom_call.1
= control target key start
LH: loop header
LB: loop body
LE: loop exit
PB: predicated region body
PF: predicated region fallthrough
CT: control target
= control target key end

     0   :  { %9 = vsyncpa [#allocation7], 0  ;;  %s531_s0 = inlined_call_operand.hbm [shape: f32[8], index: 0, kind: input, shape index: {}]   ;;  %s532_s1 = inlined_call_operand.hbm [shape: f32[8,32], index: 1, kind: input, shape index: {}]   ;;  %s533_s2 = inlined_call_operand.hbm [shape: f32[8,32,128], index: 2, kind: input, shape index: {}]   ;;  %s534_s3 = inlined_call_operand.hbm [shape: f32[8,1,128], index: 3, kind: input, shape index: {}]   ;;  %s535_s4 = inlined_call_operand.hbm [shape: f32[8,128], index: 4, kind: output, shape index: {}]  }
   0x1   :  { %10 = vsyncpa [#allocation5], 0 }
   0x2   :  { %11 = vsyncpa [#allocation10], 0  ;;  %s37_s17 = sshll.u32 %s533_s2, 4  ;;  %s38_s17 = int_to_ptr.hbm [resolvable:$true] %s37_s17 }
   0x3   :  { %12 = vsyncpa [#allocation6], 0  ;;  %s417_s18 = smov [#allocation9]   ;;  %s18_s22 = sshll.u32 %s531_s0, 4  ;;  %s19_s22 = int_to_ptr.hbm [resolvable:$true] %s18_s22 }
   0x4   :  { %s39_s19 = sshll.u32 %s417_s18, 4  ;;  %s418_s23 = smov 128   ;;  %s40_s19 = int_to_ptr.vmem [resolvable:$true] %s39_s19 }
   0x5   :  { %s419_s24 = smov 8   ;;  %s420_s25 = smov [#allocation4]  }
   0x6   :  { %45 = dma.hbm_to_vmem [thread:$0]  %s38_s17, 4096, %s40_s19, [#allocation10], %s418_s23, %s418_s23, %s419_s24  }
   0x7   :  { %21 = dma.hbm_to_smem %s19_s22, 16, %s420_s25, [#allocation7]  }
   0x8   :  { %s27_s28 = sshll.u32 %s532_s1, 4  ;;  %s421_s2 = smov [#allocation8]   ;;  %s28_s28 = int_to_ptr.hbm [resolvable:$true] %s27_s28 }
   0x9   :  { %s29_s29 = sshll.u32 %s421_s2, 4  ;;  %s50_s6 = sshll.u32 %s534_s3, 4  ;;  %s30_s29 = int_to_ptr.vmem [resolvable:$true] %s29_s29  ;;  %s51_s6 = int_to_ptr.hbm [resolvable:$true] %s50_s6 }
   0xa   :  { %32 = dma.hbm_to_vmem [thread:$0]  %s28_s28, 128, %s30_s29, [#allocation5]  }
   0xb   :  { %s422_s0 = smov [#allocation11]   ;;  %s423_s8 = smov 16  }
   0xc   :  { %s52_s7 = sshll.u32 %s422_s0, 4  ;;  %s424_s9 = smov 1   ;;  %s53_s7 = int_to_ptr.vmem [resolvable:$true] %s52_s7 }
   0xd   :  { %58 = dma.hbm_to_vmem [thread:$0]  %s51_s6, 128, %s53_s7, [#allocation10], %s423_s8, %s423_s8, %s424_s9  }
   0xe   :  { %409 = dma.done.wait [#allocation7], 16  }
   0xf   :  { %410 = vsyncadd [#allocation7], 4294967280 }
  0x10   :  { %411 = dma.done.wait [#allocation5], 128  }
  0x11   :  { %412 = vsyncadd [#allocation5], 4294967168 }
  0x12   :  { %413 = dma.done.wait [#allocation10], 4224  }
  0x13   :  { %414 = vsyncadd [#allocation10], 4294963072 }
  0x14   :  { %75 = sfence }
  0x15   :  { %s80_s1 = sld [smem:[#allocation4]]  ;;  %v84_v0 = vld [vmem:[#allocation9 + $0x18] sm:$0xff]  ;;  %v90_v1 = vld [vmem:[#allocation11] sm:$0x1]  ;;  %v108_v3 = vld [vmem:[#allocation11 + $0x1] sm:$0x1] }
  0x16   :  { %s283_s10 = sld [smem:[#allocation4 + $0x1]]  ;;  %v97_v2 = vld [vmem:[#allocation9 + $0x38] sm:$0xff]  ;;  %v127_v6 = vld [vmem:[#allocation11 + $0x2] sm:$0x1]  ;;  %v83_v7 = vld [vmem:[#allocation9 + $0x10] sm:$0xff]  ;;  %vm239_vm0 = vcmask 261120  }
  0x17   :  { %s284_s11 = sld [smem:[#allocation4 + $0x2]]  ;;  %v116_v4 = vld [vmem:[#allocation9 + $0x58] sm:$0xff]  ;;  %v96_v8 = vld [vmem:[#allocation9 + $0x30] sm:$0xff]  ;;  %v146_v13 = vld [vmem:[#allocation11 + $0x3] sm:$0x1]  ;;  %s425_s16 = smov [#allocation12]  }
  0x18   :  { %s285_s12 = sld [smem:[#allocation4 + $0x3]]  ;;  %v135_v12 = vld [vmem:[#allocation9 + $0x78] sm:$0xff]  ;;  %v115_v19 = vld [vmem:[#allocation9 + $0x50] sm:$0xff]  ;;  %v165_v24 = vld [vmem:[#allocation11 + $0x4] sm:$0x1]  ;;  %s269_s17 = sshll.u32 %s425_s16, 4  ;;  %s270_s17 = int_to_ptr.vmem [resolvable:$true] %s269_s17 }
  0x19   :  { %s463_s3 = sld [smem:[#allocation4 + $0x4]]  ;;  %v154_v23 = vld [vmem:[#allocation9 + $0x98] sm:$0xff]  ;;  %v134_v29 = vld [vmem:[#allocation9 + $0x70] sm:$0xff]  ;;  %v184_v33 = vld [vmem:[#allocation11 + $0x5] sm:$0x1]  ;;  %s271_s20 = sshll.u32 %s535_s4, 4  ;;  %s272_s20 = int_to_ptr.hbm [resolvable:$true] %s271_s20 }
  0x1a   :  { %s287_s13 = sld [smem:[#allocation4 + $0x5]]  ;;  %v173_v31 = vld [vmem:[#allocation9 + $0xb8] sm:$0xff]  ;;  %v153_v41 = vld [vmem:[#allocation9 + $0x90] sm:$0xff]  ;;  %v203_v43 = vld [vmem:[#allocation11 + $0x6] sm:$0x1] }
  0x1b   :  { %v465_v5 = vstv %s80_s1  ;;  %s467_s14 = sld [smem:[#allocation4 + $0x6]]  ;;  %v192_v40 = vld [vmem:[#allocation9 + $0xd8] sm:$0xff]  ;;  %v172_v51 = vld [vmem:[#allocation9 + $0xb0] sm:$0xff]  ;;  %v82_v52 = vld [vmem:[#allocation9 + $0x8] sm:$0xff] }
  0x1c   :  { %v89_v9 = vmul.f32 %v465_v5, %v84_v0  ;;  %v91_v10 = vmul.f32 %v90_v1, %v465_v5  ;;  %v471_v11 = vstv %s283_s10  ;;  %s473_s15 = sld [smem:[#allocation4 + $0x7]]  ;;  %v88_v14 = vmul.f32 %v465_v5, %v83_v7  ;;  %v211_v44 = vld [vmem:[#allocation9 + $0xf8] sm:$0xff]  ;;  %v95_v53 = vld [vmem:[#allocation9 + $0x28] sm:$0xff]  ;;  %v222_v55 = vld [vmem:[#allocation11 + $0x7] sm:$0x1] }
  0x1d   :  { %v102_v15 = vmul.f32 %v471_v11, %v97_v2  ;;  %v109_v16 = vmul.f32 %v108_v3, %v471_v11  ;;  %v478_v17 = vstv %s284_s11  ;;  %v101_v18 = vmul.f32 %v471_v11, %v96_v8  ;;  %v114_v58 = vld [vmem:[#allocation9 + $0x48] sm:$0xff]  ;;  %v191_v63 = vld [vmem:[#allocation9 + $0xd0] sm:$0xff] }
  0x1e   :  { %v121_v20 = vmul.f32 %v478_v17, %v116_v4  ;;  %v128_v21 = vmul.f32 %v127_v6, %v478_v17  ;;  %v483_v22 = vstv %s285_s12  ;;  %v120_v35 = vmul.f32 %v478_v17, %v115_v19  ;;  %v133_v0 = vld [vmem:[#allocation9 + $0x68] sm:$0xff]  ;;  %v210_v3 = vld [vmem:[#allocation9 + $0xf0] sm:$0xff] }
  0x1f   :  { %v106_v25 = vadd.f32 %v102_v15, %v89_v9  ;;  %v110_v26 = vadd.f32 %v109_v16, %v91_v10  ;;  %v140_v27 = vmul.f32 %v483_v22, %v135_v12  ;;  %v147_v28 = vmul.f32 %v146_v13, %v483_v22  ;;  %v152_v7 = vld [vmem:[#allocation9 + $0x88] sm:$0xff]  ;;  %v81_v13 = vld [vmem:[#allocation9] sm:$0xff] }
  0x20   :  { %v488_v30 = vstv %s463_s3  ;;  %v490_v32 = vstv %s287_s13  ;;  %v105_v34 = vadd.f32 %v101_v18, %v88_v14  ;;  %v139_v46 = vmul.f32 %v483_v22, %v134_v29  ;;  %v94_v14 = vld [vmem:[#allocation9 + $0x20] sm:$0xff] }
  0x21   :  { %v125_v36 = vadd.f32 %v121_v20, %v106_v25  ;;  %v129_v37 = vadd.f32 %v128_v21, %v110_v26  ;;  %v159_v38 = vmul.f32 %v488_v30, %v154_v23  ;;  %v166_v39 = vmul.f32 %v165_v24, %v488_v30  ;;  %v171_v20 = vld [vmem:[#allocation9 + $0xa8] sm:$0xff]  ;;  %v113_v21 = vld [vmem:[#allocation9 + $0x40] sm:$0xff] }
  0x22   :  { %v496_v42 = vstv %s467_s14  ;;  %v499_v45 = vstv %s473_s15  ;;  %v178_v49 = vmul.f32 %v490_v32, %v173_v31  ;;  %v185_v50 = vmul.f32 %v184_v33, %v490_v32  ;;  %v190_v31 = vld [vmem:[#allocation9 + $0xc8] sm:$0xff] }
  0x23   :  { %v144_v47 = vadd.f32 %v140_v27, %v125_v36  ;;  %v148_v48 = vadd.f32 %v147_v28, %v129_v37  ;;  %v197_v54 = vmul.f32 %v496_v42, %v192_v40  ;;  %v124_v56 = vadd.f32 %v120_v35, %v105_v34  ;;  %v132_v27 = vld [vmem:[#allocation9 + $0x60] sm:$0xff] }
  0x24   :  { %v158_v57 = vmul.f32 %v488_v30, %v153_v41  ;;  %v204_v61 = vmul.f32 %v203_v43, %v496_v42  ;;  %v216_v62 = vmul.f32 %v499_v45, %v211_v44  ;;  %v177_v2 = vmul.f32 %v490_v32, %v172_v51  ;;  %v189_v51 = vld [vmem:[#allocation9 + $0xc0] sm:$0xff] }
  0x25   :  { %v163_v59 = vadd.f32 %v159_v38, %v144_v47  ;;  %v167_v60 = vadd.f32 %v166_v39, %v148_v48  ;;  %v143_v1 = vadd.f32 %v139_v46, %v124_v56  ;;  %v87_v4 = vmul.f32 %v465_v5, %v82_v52  ;;  %v151_v39 = vld [vmem:[#allocation9 + $0x80] sm:$0xff]  ;;  %v209_v47 = vld [vmem:[#allocation9 + $0xe8] sm:$0xff] }
  0x26   :  { %v100_v6 = vmul.f32 %v471_v11, %v95_v53  ;;  %v223_v10 = vmul.f32 %v222_v55, %v499_v45  ;;  %v119_v12 = vmul.f32 %v478_v17, %v114_v58  ;;  %v196_v16 = vmul.f32 %v496_v42, %v191_v63 }
  0x27   :  { %v182_v8 = vadd.f32 %v178_v49, %v163_v59  ;;  %v186_v9 = vadd.f32 %v185_v50, %v167_v60  ;;  %v162_v15 = vadd.f32 %v158_v57, %v143_v1  ;;  %v138_v19 = vmul.f32 %v483_v22, %v133_v0 }
  0x28   :  { %v104_v18 = vadd.f32 %v100_v6, %v87_v4  ;;  %v215_v25 = vmul.f32 %v499_v45, %v210_v3  ;;  %v157_v26 = vmul.f32 %v488_v30, %v152_v7  ;;  %v86_v33 = vmul.f32 %v465_v5, %v81_v13  ;;  %v170_v5 = vld [vmem:[#allocation9 + $0xa0] sm:$0xff] }
  0x29   :  { %v201_v23 = vadd.f32 %v197_v54, %v182_v8  ;;  %v205_v24 = vadd.f32 %v204_v61, %v186_v9  ;;  %v181_v28 = vadd.f32 %v177_v2, %v162_v15  ;;  %v99_v34 = vmul.f32 %v471_v11, %v94_v14 }
  0x2a   :  { %v123_v29 = vadd.f32 %v119_v12, %v104_v18  ;;  %v176_v37 = vmul.f32 %v490_v32, %v171_v20  ;;  %v118_v38 = vmul.f32 %v478_v17, %v113_v21  ;;  %v137_v44 = vmul.f32 %v483_v22, %v132_v27  ;;  %v208_v22 = vld [vmem:[#allocation9 + $0xe0] sm:$0xff] }
  0x2b   :  { %v220_v35 = vadd.f32 %v216_v62, %v201_v23  ;;  %v224_v36 = vadd.f32 %v223_v10, %v205_v24  ;;  %v200_v40 = vadd.f32 %v196_v16, %v181_v28  ;;  %v103_v43 = vadd.f32 %v99_v34, %v86_v33  ;;  %v230_v62 = vld [vmem:[#allocation8] sm:$0xff] }
  0x2c   :  { %v142_v41 = vadd.f32 %v138_v19, %v123_v29  ;;  %v195_v46 = vmul.f32 %v496_v42, %v190_v31  ;;  %v156_v50 = vmul.f32 %v488_v30, %v151_v39  ;;  %v214_v52 = vmul.f32 %v499_v45, %v209_v47 }
  0x2d   :  { %229 = vst [vmem:[#allocation3] sm:$0x1] %v224_v36  ;;  %255 = vmatpush.msra.mxu0 %v220_v35  ;;  %v219_v48 = vadd.f32 %v215_v25, %v200_v40  ;;  %v122_v49 = vadd.f32 %v118_v38, %v103_v43  ;;  %v175_v54 = vmul.f32 %v490_v32, %v170_v5 }
  0x2e   :  { %v161_v11 = vadd.f32 %v157_v26, %v142_v41  ;;  %v194_v57 = vmul.f32 %v496_v42, %v189_v51  ;;  %v213_v60 = vmul.f32 %v499_v45, %v208_v22 }
  0x2f   :  { %256 = vmatpush.msra.mxu0 %v219_v48  ;;  %v141_v53 = vadd.f32 %v137_v44, %v122_v49 }
  0x30   :  { %v180_v17 = vadd.f32 %v176_v37, %v161_v11 }
  0x31   :  { %v160_v56 = vadd.f32 %v156_v50, %v141_v53 }
  0x32   :  { %v199_v55 = vadd.f32 %v195_v46, %v180_v17 }
  0x33   :  { %v179_v59 = vadd.f32 %v175_v54, %v160_v56 }
  0x34   :  { %v218_v58 = vadd.f32 %v214_v52, %v199_v55  ;;  %v300_v63 = vld [vmem:[#allocation3] ss:$0 sm:$0xff] }
  0x35   :  { %v198_v61 = vadd.f32 %v194_v57, %v179_v59 }
  0x36   :  { %257 = vmatpush.msra.mxu0 %v218_v58 }
  0x37   :  { %v217_v30 = vadd.f32 %v213_v60, %v198_v61 }
  0x39   :  { %258 = vmatpush.msra.mxu0 %v217_v30 }
  0x3a   :  { %290 = vmatmul.msk.f32.vlgmr.msra.gmra.mxu0 %vm239_vm0, %v230_v62 }
  0xb7   :  { %v260_v32 = vpop.f32.mrf.mxu0 }
  0xb8   :  { %v261_v42 = vadd.f32 %v300_v63, %v260_v32 }
  0xba   :  { %263 = vst [vmem:[#allocation12] sm:$0xff] %v261_v42 }
  0xbb   :  { %274 = dma.vmem_to_hbm [thread:$0]  %s270_s17, 128, %s272_s20, [#allocation6]  }
  0xbc   :  { %415 = dma.done.wait [#allocation6], 128  }
  0xbd   :  { %416 = vsyncadd [#allocation6], 4294967168 }
  0xbe   :  { %279 = vsyncpa [#allocation5], 1 }
  0xbf   :  { %280 = vsyncpa [#allocation10], 1 }
  0xc0   :  { %281 = vsyncpa [#allocation6], 1 }
  0xc1   :  { %282 = vsyncpa [#allocation7], 1 }

</bundles_post_ra>
